<compile_context>
chip_gen: v5e
topology: v5e:2x2
jax: 0.10.0
libtpu: 0.0.40
codegen_flags: <defaults>
</compile_context>

<pallas_src>
import functools

import jax
import jax.numpy as jnp
from jax.experimental import pallas as pl
from jax.experimental.pallas import tpu as pltpu


# ------------------------------ small helpers -------------------------------

def _round_up(x, m):
    return (x + m - 1) // m * m


def _fold_bn(gamma, beta, mean, var, eps=1e-5):
    scale = (gamma / jnp.sqrt(var + eps)).astype(jnp.float32)
    bias = (beta - mean * scale).astype(jnp.float32)
    return scale, bias


def _matmul_tiles(M, K_pad, Cout_pad):
    """bf16-friendly tiles: tm in {128..1024} (all multiples of 16), tn/tk 128-multiples."""
    tn = 256 if Cout_pad % 256 == 0 else 128
    # Full-K-resident weights when the tile comfortably fits VMEM (collapses the
    # reduction grid to a single step for WRN-sized K).
    if K_pad <= 2048:
        tk = K_pad
    else:
        tk = next(c for c in (2048, 1024, 512, 256, 128) if K_pad % c == 0)
    M128 = _round_up(M, 128)
    tm = next(c for c in (1024, 512, 256, 128) if M128 % c == 0)
    # Keep >= 2 parallel output tiles when possible (v7x megacore utilization).
    while tm > 256 and (M128 // tm) * (Cout_pad // tn) < 2:
        tm //= 2
    return tm, tn, tk


# ----------------------------- Pallas kernels -------------------------------

def _conv_pre_post_kernel(a_ref, b_ref, ps_ref, pb_ref, es_ref, eb_ref,
                          o_ref, acc_ref):
    """Tiled matmul; BN+ReLU fused as prologue on the A tile (per-K-column
    scale/bias) and BN+ReLU fused as epilogue on the accumulator."""
    k = pl.program_id(2)

    @pl.when(k == 0)
    def _init():
        acc_ref[...] = jnp.zeros_like(acc_ref)

    a = jnp.maximum(a_ref[...].astype(jnp.float32) * ps_ref[...] + pb_ref[...],
                    0.0)
    acc_ref[...] += jnp.dot(a.astype(jnp.bfloat16), b_ref[...],
                            preferred_element_type=jnp.float32)

    @pl.when(k == pl.num_programs(2) - 1)
    def _fin():
        y = acc_ref[...] * es_ref[...] + eb_ref[...]
        o_ref[...] = jnp.maximum(y, 0.0).astype(o_ref.dtype)


def _conv_pre_kernel(a_ref, b_ref, ps_ref, pb_ref, o_ref, acc_ref):
    """Tiled matmul with BN+ReLU fused as prologue (1x1 shortcut conv)."""
    k = pl.program_id(2)

    @pl.when(k == 0)
    def _init():
        acc_ref[...] = jnp.zeros_like(acc_ref)

    a = jnp.maximum(a_ref[...].astype(jnp.float32) * ps_ref[...] + pb_ref[...],
                    0.0)
    acc_ref[...] += jnp.dot(a.astype(jnp.bfloat16), b_ref[...],
                            preferred_element_type=jnp.float32)

    @pl.when(k == pl.num_programs(2) - 1)
    def _fin():
        o_ref[...] = acc_ref[...].astype(o_ref.dtype)


def _conv_add_kernel(a_ref, b_ref, res_ref, o_ref, acc_ref):
    """Tiled matmul; residual add fused into the epilogue (f32 math, bf16 store)."""
    k = pl.program_id(2)

    @pl.when(k == 0)
    def _init():
        acc_ref[...] = jnp.zeros_like(acc_ref)

    acc_ref[...] += jnp.dot(a_ref[...], b_ref[...],
                            preferred_element_type=jnp.float32)

    @pl.when(k == pl.num_programs(2) - 1)
    def _fin():
        o_ref[...] = (acc_ref[...] + res_ref[...].astype(jnp.float32)
                      ).astype(o_ref.dtype)


# ------------------------- gridded matmul dispatcher -------------------------

def _conv_matmul(kernel_fn, patches, wmat, extras, extra_kinds, out_dtype):
    """Shared pallas_call for all conv variants.

    extra_kinds: per extra operand, one of
      "k"  -> (1, K_pad)      array, block (1, tk),   index (0, k)
      "n"  -> (1, Cout_pad)   array, block (1, tn),   index (0, j)
      "mn" -> (M, Cout_pad)   array, block (tm, tn),  index (i, j)
    """
    M, K_pad = patches.shape
    _, Cout_pad = wmat.shape
    tm, tn, tk = _matmul_tiles(M, K_pad, Cout_pad)
    M_pad = _round_up(M, tm)
    if M_pad != M:
        patches = jnp.pad(patches, ((0, M_pad - M), (0, 0)))
        extras = tuple(
            jnp.pad(e, ((0, M_pad - M), (0, 0))) if kind == "mn" else e
            for e, kind in zip(extras, extra_kinds))
    else:
        extras = tuple(extras)

    spec_builders = {
        "k": lambda: pl.BlockSpec((1, tk), lambda i, j, k: (0, k)),
        "n": lambda: pl.BlockSpec((1, tn), lambda i, j, k: (0, j)),
        "mn": lambda: pl.BlockSpec((tm, tn), lambda i, j, k: (i, j)),
    }
    extra_specs = [spec_builders[kind]() for kind in extra_kinds]

    # VMEM budget from the actual double-buffered footprint (+ margin), instead
    # of a hardcoded limit (keeps headroom on v7x's 64 MiB).
    out_isz = jnp.dtype(out_dtype).itemsize
    extra_block_bytes = 0
    for e, kind in zip(extras, extra_kinds):
        blk_elems = {"k": tk, "n": tn, "mn": tm * tn}[kind]
        extra_block_bytes += blk_elems * e.dtype.itemsize
    vmem_need = (2 * (tm * tk * 2 + tk * tn * 2 + extra_block_bytes
                      + tm * tn * out_isz) + tm * tn * 4 + (4 << 20))
    vmem_limit = int(min(max(vmem_need, 16 << 20), 64 << 20))

    bytes_accessed = int(
        patches.size * patches.dtype.itemsize
        + wmat.size * wmat.dtype.itemsize
        + sum(int(e.size) * e.dtype.itemsize for e in extras)
        + M_pad * Cout_pad * out_isz)
    cost = pl.CostEstimate(flops=2 * M_pad * K_pad * Cout_pad,
                           transcendentals=0,
                           bytes_accessed=bytes_accessed)

    grid = (M_pad // tm, Cout_pad // tn, K_pad // tk)
    return pl.pallas_call(
        kernel_fn,
        out_shape=jax.ShapeDtypeStruct((M_pad, Cout_pad), out_dtype),
        grid=grid,
        in_specs=[pl.BlockSpec((tm, tk), lambda i, j, k: (i, k)),
                  pl.BlockSpec((tk, tn), lambda i, j, k: (k, j)),
                  *extra_specs],
        out_specs=pl.BlockSpec((tm, tn), lambda i, j, k: (i, j)),
        scratch_shapes=[pltpu.VMEM((tm, tn), jnp.float32)],
        compiler_params=pltpu.CompilerParams(
            dimension_semantics=("parallel", "parallel", "arbitrary"),
            vmem_limit_bytes=vmem_limit),
        cost_estimate=cost,
    )(patches, wmat, *extras)


# --------------------------------- im2col ------------------------------------

def _im2col(x, kh, kw, stride, padding, k_pad_to, pad_value=None):
    """(N,H,W,C) -> (N*Ho*Wo, k_pad_to) patches, column order (kh, kw, cin).
    The zero K-tail padding is fused into the single concat (no extra jnp.pad
    pass).  `pad_value` is an optional per-channel spatial-pad value (used so
    that a fused BN+ReLU prologue maps padded positions to exactly 0)."""
    N, H, W, C = x.shape
    Ho = (H + 2 * padding - kh) // stride + 1
    Wo = (W + 2 * padding - kw) // stride + 1
    if padding > 0:
        Hp, Wp = H + 2 * padding, W + 2 * padding
        if pad_value is None:
            xp = jnp.pad(x, ((0, 0), (padding, padding), (padding, padding),
                             (0, 0)))
        else:
            xp = jnp.broadcast_to(pad_value.astype(x.dtype).reshape(1, 1, 1, C),
                                  (N, Hp, Wp, C))
            xp = xp.at[:, padding:padding + H, padding:padding + W, :].set(x)
    else:
        xp = x
    cols = []
    for i in range(kh):
        for j in range(kw):
            cols.append(xp[:, i:i + Ho * stride:stride,
                           j:j + Wo * stride:stride, :])
    K = kh * kw * C
    if k_pad_to > K:
        cols.append(jnp.zeros((N, Ho, Wo, k_pad_to - K), x.dtype))
    patches = jnp.concatenate(cols, axis=-1).reshape(N * Ho * Wo,
                                                     max(K, k_pad_to))
    return patches, (N, Ho, Wo)


def _prologue_scale_bias(scale, bias, kh, kw, K_pad):
    """Per-K-column scale/bias matching the (kh, kw, cin) patch column order."""
    K = kh * kw * scale.shape[0]
    ps = jnp.pad(jnp.tile(scale, kh * kw), (0, K_pad - K)).reshape(1, K_pad)
    pb = jnp.pad(jnp.tile(bias, kh * kw), (0, K_pad - K)).reshape(1, K_pad)
    return ps.astype(jnp.float32), pb.astype(jnp.float32)


def _spatial_pad_value(scale):
    # relu(scale * (-sign(scale)*BIG) + bias) == 0 for scale != 0, so padded
    # border pixels contribute exactly 0 after the fused BN+ReLU prologue.
    # TODO(synk): if a BN gamma is exactly 0, padded border pixels differ from
    #             PyTorch (degenerate case).
    return -jnp.sign(scale) * jnp.float32(1e30)


# ----------------------------- conv variants ---------------------------------

def conv_bn_pre_post(x_nhwc, wmat, bn_pre, bn_post, *, kh, kw, cin, cout,
                     stride, padding, out_dtype=jnp.bfloat16):
    """relu(bn_post( conv( relu(bn_pre(x)) ) )) in one matmul kernel."""
    K_pad, Cout_pad = wmat.shape
    scale1, bias1 = bn_pre
    pad_value = _spatial_pad_value(scale1) if padding > 0 else None
    patches, (N, Ho, Wo) = _im2col(x_nhwc.astype(jnp.bfloat16), kh, kw, stride,
                                   padding, K_pad, pad_value)
    ps, pb = _prologue_scale_bias(scale1, bias1, kh, kw, K_pad)
    scale2, bias2 = bn_post
    es = jnp.pad(scale2, (0, Cout_pad - cout)).reshape(1, Cout_pad)
    eb = jnp.pad(bias2, (0, Cout_pad - cout)).reshape(1, Cout_pad)
    out = _conv_matmul(_conv_pre_post_kernel, patches, wmat,
                       (ps, pb, es, eb), ("k", "k", "n", "n"), out_dtype)
    M = N * Ho * Wo
    return out[:M, :cout].reshape(N, Ho, Wo, cout)


def conv_bn_pre(x_nhwc, wmat, bn_pre, *, kh, kw, cin, cout, stride, padding,
                out_dtype=jnp.bfloat16):
    """conv( relu(bn_pre(x)) ) — used for the 1x1 strided shortcut conv2."""
    K_pad, Cout_pad = wmat.shape
    scale1, bias1 = bn_pre
    pad_value = _spatial_pad_value(scale1) if padding > 0 else None
    patches, (N, Ho, Wo) = _im2col(x_nhwc.astype(jnp.bfloat16), kh, kw, stride,
                                   padding, K_pad, pad_value)
    ps, pb = _prologue_scale_bias(scale1, bias1, kh, kw, K_pad)
    out = _conv_matmul(_conv_pre_kernel, patches, wmat, (ps, pb), ("k", "k"),
                       out_dtype)
    M = N * Ho * Wo
    return out[:M, :cout].reshape(N, Ho, Wo, cout)


def conv_residual_add(x_nhwc, wmat, shortcut_nhwc, *, kh, kw, cout, stride,
                      padding, out_dtype=jnp.bfloat16):
    """conv(x) + shortcut, with the add fused into the matmul epilogue
    (f32 math, bf16 store)."""
    K_pad, Cout_pad = wmat.shape
    patches, (N, Ho, Wo) = _im2col(x_nhwc.astype(jnp.bfloat16), kh, kw, stride,
                                   padding, K_pad, None)
    M = N * Ho * Wo
    sc = shortcut_nhwc.astype(jnp.bfloat16).reshape(M, cout)
    sc = jnp.pad(sc, ((0, 0), (0, Cout_pad - cout)))
    out = _conv_matmul(_conv_add_kernel, patches, wmat, (sc,), ("mn",),
                       out_dtype)
    return out[:M, :cout].reshape(N, Ho, Wo, cout)


# ----------------------- WRNBasicBlock / NetworkBlock ------------------------

def wrn_basic_block(x_nhwc, params, *, stride, equal_in_out, in_planes,
                    out_planes):
    """Matches WRNBasicBlock.forward (inference BN, dropRate=0)."""
    bn1 = _fold_bn(*params["bn1"])
    bn2 = _fold_bn(*params["bn2"])
    # conv0 (3x3, stride, pad 1): BN1+ReLU1 fused prologue, BN2+ReLU2 fused
    # epilogue -> the activated tensors never hit HBM.
    out0 = conv_bn_pre_post(x_nhwc, params["conv0_w"], bn1, bn2,
                            kh=3, kw=3, cin=in_planes, cout=out_planes,
                            stride=stride, padding=1)
    if equal_in_out:
        shortcut = x_nhwc                              # original (un-activated) x
    else:
        # PyTorch reassigns x = relu1(bn1(x)) before conv2: same BN1+ReLU1 is
        # fused into the 1x1 shortcut conv's prologue.
        shortcut = conv_bn_pre(x_nhwc, params["conv2_w"], bn1,
                               kh=1, kw=1, cin=in_planes, cout=out_planes,
                               stride=stride, padding=0)
    # dropRate == 0.0 -> dropout is identity
    # conv1 (3x3, stride 1, pad 1) with the residual add fused into its epilogue.
    return conv_residual_add(out0, params["conv1_w"], shortcut,
                             kh=3, kw=3, cout=out_planes, stride=1, padding=1)


# ------------------------------ parameter init -------------------------------

def _prep_conv_weight(w_oihw):
    """OIHW -> (kh*kw*cin, cout) matmul layout, zero-padded to 128 multiples, bf16."""
    Cout, Cin, KH, KW = w_oihw.shape
    K = KH * KW * Cin
    K_pad = _round_up(K, 128)
    Cout_pad = _round_up(Cout, 128)
    wmat = jnp.transpose(w_oihw, (2, 3, 1, 0)).reshape(K, Cout)
    wmat = jnp.pad(wmat, ((0, K_pad - K), (0, Cout_pad - Cout)))
    return wmat.astype(jnp.bfloat16)


def init_bn_params(key, c):
    k1, k2, k3, k4 = jax.random.split(key, 4)
    gamma = 1.0 + 0.1 * jax.random.normal(k1, (c,), jnp.float32)
    beta = 0.1 * jax.random.normal(k2, (c,), jnp.float32)
    mean = 0.1 * jax.random.normal(k3, (c,), jnp.float32)
    var = 1.0 + 0.1 * jax.random.uniform(k4, (c,), jnp.float32)
    return (gamma, beta, mean, var)


def init_block_params(key, in_planes, out_planes, equal_in_out):
    keys = jax.random.split(key, 5)
    p = {
        "bn1": init_bn_params(keys[0], in_planes),
        "conv0_w": _prep_conv_weight(
            0.1 * jax.random.normal(keys[1], (out_planes, in_planes, 3, 3),
                                    jnp.float32)),
        "bn2": init_bn_params(keys[2], out_planes),
        "conv1_w": _prep_conv_weight(
            0.1 * jax.random.normal(keys[3], (out_planes, out_planes, 3, 3),
                                    jnp.float32)),
    }
    if not equal_in_out:
        p["conv2_w"] = _prep_conv_weight(
            0.1 * jax.random.normal(keys[4], (out_planes, in_planes, 1, 1),
                                    jnp.float32))
    return p


def init_network_block_params(key, nb_layers, in_planes, out_planes):
    params = []
    keys = jax.random.split(key, nb_layers)
    for i in range(nb_layers):
        ip = in_planes if i == 0 else out_planes
        params.append(init_block_params(keys[i], ip, out_planes,
                                        ip == out_planes))
    return params


def network_block_forward(x_nchw, params, nb_layers, in_planes, out_planes,
                          stride):
    """NetworkBlock.forward. Input/output NCHW (PyTorch convention)."""
    x = jnp.transpose(x_nchw, (0, 2, 3, 1)).astype(jnp.bfloat16)   # NHWC, bf16
    for i in range(nb_layers):
        ip = in_planes if i == 0 else out_planes
        st = stride if i == 0 else 1
        x = wrn_basic_block(x, params[i], stride=st,
                            equal_in_out=(ip == out_planes),
                            in_planes=ip, out_planes=out_planes)
    return jnp.transpose(x.astype(jnp.float32), (0, 3, 1, 2))      # NCHW, f32


# ---------------------------------- main -------------------------------------

if __name__ == "__main__":
    # WRN layer with 2 basic blocks, in_planes=4 -> out_planes=8, stride=2, dropRate=0.0
    N, C_IN, H, W = 2, 4, 16, 16
    C_OUT, NB_LAYERS, STRIDE = 8, 2, 2

    key = jax.random.PRNGKey(0)
    kx, kp = jax.random.split(key)
    x = jax.random.normal(kx, (N, C_IN, H, W), jnp.float32)
    params = init_network_block_params(kp, NB_LAYERS, C_IN, C_OUT)

    fwd = jax.jit(functools.partial(
        network_block_forward,
        nb_layers=NB_LAYERS, in_planes=C_IN, out_planes=C_OUT, stride=STRIDE))
    y = fwd(x, params)
    jax.block_until_ready(y)

    expected_shape = (N, C_OUT, H // STRIDE, W // STRIDE)
    assert y.shape == expected_shape, (y.shape, expected_shape)
    assert bool(jnp.all(jnp.isfinite(y)))
    print("KERNEL_OK")
</pallas_src>

<mosaic_0001>
module attributes {stable_mosaic.version = 11 : i64} {
  func.func @_conv_pre_post_kernel(%arg0: i32, %arg1: i32, %arg2: i32, %arg3: memref<128x128xbf16, #tpu.memory_space<vmem>>, %arg4: memref<128x128xbf16, #tpu.memory_space<vmem>>, %arg5: memref<1x128xf32, #tpu.memory_space<vmem>>, %arg6: memref<1x128xf32, #tpu.memory_space<vmem>>, %arg7: memref<1x128xf32, #tpu.memory_space<vmem>>, %arg8: memref<1x128xf32, #tpu.memory_space<vmem>>, %arg9: memref<128x128xbf16, #tpu.memory_space<vmem>>, %arg10: memref<128x128xf32, #tpu.memory_space<vmem>>) attributes {dimension_semantics = [#tpu.dimension_semantics<parallel>, #tpu.dimension_semantics<parallel>, #tpu.dimension_semantics<arbitrary>], iteration_bounds = array<i64: 1, 1, 1>, scalar_prefetch = 0 : i64, scratch_operands = 1 : i64, tpu.core_type = #tpu.core_type<tc>, window_params = [{transform_indices = @transform_0, window_bounds = array<i64: 128, 128>}, {transform_indices = @transform_1, window_bounds = array<i64: 128, 128>}, {transform_indices = @transform_2, window_bounds = array<i64: 1, 128>}, {transform_indices = @transform_3, window_bounds = array<i64: 1, 128>}, {transform_indices = @transform_4, window_bounds = array<i64: 1, 128>}, {transform_indices = @transform_5, window_bounds = array<i64: 1, 128>}, {transform_indices = @transform_6, window_bounds = array<i64: 128, 128>}]} {
    %c0_i32 = arith.constant 0 : i32
    %0 = arith.cmpi eq, %arg2, %c0_i32 : i32
    %1 = arith.extui %0 : i1 to i32
    %c0_i32_0 = arith.constant 0 : i32
    %2 = arith.cmpi ne, %1, %c0_i32_0 : i32
    scf.if %2 {
      %cst_15 = arith.constant 0.000000e+00 : f32
      %22 = vector.broadcast %cst_15 : f32 to vector<128x128xf32>
      %c0_16 = arith.constant 0 : index
      %c0_17 = arith.constant 0 : index
      %23 = vector.load %arg10[%c0_16, %c0_17] : memref<128x128xf32, #tpu.memory_space<vmem>>, vector<128x128xf32>
      tpu.vector_store %arg10[%c0_16, %c0_17], %22 {strides = array<i32>} : memref<128x128xf32, #tpu.memory_space<vmem>>, vector<128x128xf32>,
    } else {
    }
    %c0 = arith.constant 0 : index
    %c0_1 = arith.constant 0 : index
    %3 = vector.load %arg3[%c0, %c0_1] : memref<128x128xbf16, #tpu.memory_space<vmem>>, vector<128x128xbf16>
    %4 = arith.extf %3 : vector<128x128xbf16> to vector<128x128xf32>
    %c0_2 = arith.constant 0 : index
    %c0_3 = arith.constant 0 : index
    %5 = vector.load %arg5[%c0_2, %c0_3] : memref<1x128xf32, #tpu.memory_space<vmem>>, vector<1x128xf32>
    %6 = vector.broadcast %5 : vector<1x128xf32> to vector<128x128xf32>
    %7 = arith.mulf %4, %6 : vector<128x128xf32>
    %c0_4 = arith.constant 0 : index
    %c0_5 = arith.constant 0 : index
    %8 = vector.load %arg6[%c0_4, %c0_5] : memref<1x128xf32, #tpu.memory_space<vmem>>, vector<1x128xf32>
    %9 = vector.broadcast %8 : vector<1x128xf32> to vector<128x128xf32>
    %10 = arith.addf %7, %9 : vector<128x128xf32>
    %cst = arith.constant 0.000000e+00 : f32
    %11 = vector.broadcast %cst : f32 to vector<128x128xf32>
    %12 = arith.maximumf %10, %11 : vector<128x128xf32>
    %c0_6 = arith.constant 0 : index
    %c0_7 = arith.constant 0 : index
    %13 = vector.load %arg10[%c0_6, %c0_7] : memref<128x128xf32, #tpu.memory_space<vmem>>, vector<128x128xf32>
    %14 = arith.truncf %12 : vector<128x128xf32> to vector<128x128xbf16>
    %c0_8 = arith.constant 0 : index
    %c0_9 = arith.constant 0 : index
    %15 = vector.load %arg4[%c0_8, %c0_9] : memref<128x128xbf16, #tpu.memory_space<vmem>>, vector<128x128xbf16>
    %cst_10 = arith.constant dense<0.000000e+00> : vector<128x128xf32>
    %16 = tpu.matmul %14, %15, %cst_10 {dimension_numbers = #tpu.dot_dimension_numbers<[1], [0], [0], [1], [0, 0, 1, 1], [], []>} : vector<128x128xbf16>, vector<128x128xbf16>, vector<128x128xf32> -> vector<128x128xf32>
    %17 = arith.addf %13, %16 : vector<128x128xf32>
    %c0_11 = arith.constant 0 : index
    %c0_12 = arith.constant 0 : index
    %18 = vector.load %arg10[%c0_11, %c0_12] : memref<128x128xf32, #tpu.memory_space<vmem>>, vector<128x128xf32>
    tpu.vector_store %arg10[%c0_11, %c0_12], %17 {strides = array<i32>} : memref<128x128xf32, #tpu.memory_space<vmem>>, vector<128x128xf32>,
    %c0_i32_13 = arith.constant 0 : i32
    %19 = arith.cmpi eq, %arg2, %c0_i32_13 : i32
    %20 = arith.extui %19 : i1 to i32
    %c0_i32_14 = arith.constant 0 : i32
    %21 = arith.cmpi ne, %20, %c0_i32_14 : i32
    scf.if %21 {
      %c0_15 = arith.constant 0 : index
      %c0_16 = arith.constant 0 : index
      %22 = vector.load %arg10[%c0_15, %c0_16] : memref<128x128xf32, #tpu.memory_space<vmem>>, vector<128x128xf32>
      %c0_17 = arith.constant 0 : index
      %c0_18 = arith.constant 0 : index
      %23 = vector.load %arg7[%c0_17, %c0_18] : memref<1x128xf32, #tpu.memory_space<vmem>>, vector<1x128xf32>
      %24 = vector.broadcast %23 : vector<1x128xf32> to vector<128x128xf32>
      %25 = arith.mulf %22, %24 : vector<128x128xf32>
      %c0_19 = arith.constant 0 : index
      %c0_20 = arith.constant 0 : index
      %26 = vector.load %arg8[%c0_19, %c0_20] : memref<1x128xf32, #tpu.memory_space<vmem>>, vector<1x128xf32>
      %27 = vector.broadcast %26 : vector<1x128xf32> to vector<128x128xf32>
      %28 = arith.addf %25, %27 : vector<128x128xf32>
      %cst_21 = arith.constant 0.000000e+00 : f32
      %29 = vector.broadcast %cst_21 : f32 to vector<128x128xf32>
      %30 = arith.maximumf %28, %29 : vector<128x128xf32>
      %31 = arith.truncf %30 : vector<128x128xf32> to vector<128x128xbf16>
      %c0_22 = arith.constant 0 : index
      %c0_23 = arith.constant 0 : index
      %32 = vector.load %arg9[%c0_22, %c0_23] : memref<128x128xbf16, #tpu.memory_space<vmem>>, vector<128x128xbf16>
      tpu.vector_store %arg9[%c0_22, %c0_23], %31 {strides = array<i32>} : memref<128x128xbf16, #tpu.memory_space<vmem>>, vector<128x128xbf16>,
    } else {
    }
    return
  }
  func.func @transform_0(%arg0: i32, %arg1: i32, %arg2: i32) -> (i32, i32) {
    %c0_i32 = arith.constant 0 : i32
    return %arg0, %arg2 : i32, i32
  }
  func.func @transform_1(%arg0: i32, %arg1: i32, %arg2: i32) -> (i32, i32) {
    %c0_i32 = arith.constant 0 : i32
    return %arg2, %arg1 : i32, i32
  }
  func.func @transform_2(%arg0: i32, %arg1: i32, %arg2: i32) -> (i32, i32) {
    %c0_i32 = arith.constant 0 : i32
    %c0_i32_0 = arith.constant 0 : i32
    return %c0_i32, %arg2 : i32, i32
  }
  func.func @transform_3(%arg0: i32, %arg1: i32, %arg2: i32) -> (i32, i32) {
    %c0_i32 = arith.constant 0 : i32
    %c0_i32_0 = arith.constant 0 : i32
    return %c0_i32, %arg2 : i32, i32
  }
  func.func @transform_4(%arg0: i32, %arg1: i32, %arg2: i32) -> (i32, i32) {
    %c0_i32 = arith.constant 0 : i32
    %c0_i32_0 = arith.constant 0 : i32
    return %c0_i32, %arg1 : i32, i32
  }
  func.func @transform_5(%arg0: i32, %arg1: i32, %arg2: i32) -> (i32, i32) {
    %c0_i32 = arith.constant 0 : i32
    %c0_i32_0 = arith.constant 0 : i32
    return %c0_i32, %arg1 : i32, i32
  }
  func.func @transform_6(%arg0: i32, %arg1: i32, %arg2: i32) -> (i32, i32) {
    %c0_i32 = arith.constant 0 : i32
    return %arg0, %arg1 : i32, i32
  }
}

module attributes {stable_mosaic.version = 11 : i64} {
  func.func @_conv_pre_kernel(%arg0: i32, %arg1: i32, %arg2: i32, %arg3: memref<128x128xbf16, #tpu.memory_space<vmem>>, %arg4: memref<128x128xbf16, #tpu.memory_space<vmem>>, %arg5: memref<1x128xf32, #tpu.memory_space<vmem>>, %arg6: memref<1x128xf32, #tpu.memory_space<vmem>>, %arg7: memref<128x128xbf16, #tpu.memory_space<vmem>>, %arg8: memref<128x128xf32, #tpu.memory_space<vmem>>) attributes {dimension_semantics = [#tpu.dimension_semantics<parallel>, #tpu.dimension_semantics<parallel>, #tpu.dimension_semantics<arbitrary>], iteration_bounds = array<i64: 1, 1, 1>, scalar_prefetch = 0 : i64, scratch_operands = 1 : i64, tpu.core_type = #tpu.core_type<tc>, window_params = [{transform_indices = @transform_0, window_bounds = array<i64: 128, 128>}, {transform_indices = @transform_1, window_bounds = array<i64: 128, 128>}, {transform_indices = @transform_2, window_bounds = array<i64: 1, 128>}, {transform_indices = @transform_3, window_bounds = array<i64: 1, 128>}, {transform_indices = @transform_4, window_bounds = array<i64: 128, 128>}]} {
    %c0_i32 = arith.constant 0 : i32
    %0 = arith.cmpi eq, %arg2, %c0_i32 : i32
    %1 = arith.extui %0 : i1 to i32
    %c0_i32_0 = arith.constant 0 : i32
    %2 = arith.cmpi ne, %1, %c0_i32_0 : i32
    scf.if %2 {
      %cst_15 = arith.constant 0.000000e+00 : f32
      %22 = vector.broadcast %cst_15 : f32 to vector<128x128xf32>
      %c0_16 = arith.constant 0 : index
      %c0_17 = arith.constant 0 : index
      %23 = vector.load %arg8[%c0_16, %c0_17] : memref<128x128xf32, #tpu.memory_space<vmem>>, vector<128x128xf32>
      tpu.vector_store %arg8[%c0_16, %c0_17], %22 {strides = array<i32>} : memref<128x128xf32, #tpu.memory_space<vmem>>, vector<128x128xf32>,
    } else {
    }
    %c0 = arith.constant 0 : index
    %c0_1 = arith.constant 0 : index
    %3 = vector.load %arg3[%c0, %c0_1] : memref<128x128xbf16, #tpu.memory_space<vmem>>, vector<128x128xbf16>
    %4 = arith.extf %3 : vector<128x128xbf16> to vector<128x128xf32>
    %c0_2 = arith.constant 0 : index
    %c0_3 = arith.constant 0 : index
    %5 = vector.load %arg5[%c0_2, %c0_3] : memref<1x128xf32, #tpu.memory_space<vmem>>, vector<1x128xf32>
    %6 = vector.broadcast %5 : vector<1x128xf32> to vector<128x128xf32>
    %7 = arith.mulf %4, %6 : vector<128x128xf32>
    %c0_4 = arith.constant 0 : index
    %c0_5 = arith.constant 0 : index
    %8 = vector.load %arg6[%c0_4, %c0_5] : memref<1x128xf32, #tpu.memory_space<vmem>>, vector<1x128xf32>
    %9 = vector.broadcast %8 : vector<1x128xf32> to vector<128x128xf32>
    %10 = arith.addf %7, %9 : vector<128x128xf32>
    %cst = arith.constant 0.000000e+00 : f32
    %11 = vector.broadcast %cst : f32 to vector<128x128xf32>
    %12 = arith.maximumf %10, %11 : vector<128x128xf32>
    %c0_6 = arith.constant 0 : index
    %c0_7 = arith.constant 0 : index
    %13 = vector.load %arg8[%c0_6, %c0_7] : memref<128x128xf32, #tpu.memory_space<vmem>>, vector<128x128xf32>
    %14 = arith.truncf %12 : vector<128x128xf32> to vector<128x128xbf16>
    %c0_8 = arith.constant 0 : index
    %c0_9 = arith.constant 0 : index
    %15 = vector.load %arg4[%c0_8, %c0_9] : memref<128x128xbf16, #tpu.memory_space<vmem>>, vector<128x128xbf16>
    %cst_10 = arith.constant dense<0.000000e+00> : vector<128x128xf32>
    %16 = tpu.matmul %14, %15, %cst_10 {dimension_numbers = #tpu.dot_dimension_numbers<[1], [0], [0], [1], [0, 0, 1, 1], [], []>} : vector<128x128xbf16>, vector<128x128xbf16>, vector<128x128xf32> -> vector<128x128xf32>
    %17 = arith.addf %13, %16 : vector<128x128xf32>
    %c0_11 = arith.constant 0 : index
    %c0_12 = arith.constant 0 : index
    %18 = vector.load %arg8[%c0_11, %c0_12] : memref<128x128xf32, #tpu.memory_space<vmem>>, vector<128x128xf32>
    tpu.vector_store %arg8[%c0_11, %c0_12], %17 {strides = array<i32>} : memref<128x128xf32, #tpu.memory_space<vmem>>, vector<128x128xf32>,
    %c0_i32_13 = arith.constant 0 : i32
    %19 = arith.cmpi eq, %arg2, %c0_i32_13 : i32
    %20 = arith.extui %19 : i1 to i32
    %c0_i32_14 = arith.constant 0 : i32
    %21 = arith.cmpi ne, %20, %c0_i32_14 : i32
    scf.if %21 {
      %c0_15 = arith.constant 0 : index
      %c0_16 = arith.constant 0 : index
      %22 = vector.load %arg8[%c0_15, %c0_16] : memref<128x128xf32, #tpu.memory_space<vmem>>, vector<128x128xf32>
      %23 = arith.truncf %22 : vector<128x128xf32> to vector<128x128xbf16>
      %c0_17 = arith.constant 0 : index
      %c0_18 = arith.constant 0 : index
      %24 = vector.load %arg7[%c0_17, %c0_18] : memref<128x128xbf16, #tpu.memory_space<vmem>>, vector<128x128xbf16>
      tpu.vector_store %arg7[%c0_17, %c0_18], %23 {strides = array<i32>} : memref<128x128xbf16, #tpu.memory_space<vmem>>, vector<128x128xbf16>,
    } else {
    }
    return
  }
  func.func @transform_0(%arg0: i32, %arg1: i32, %arg2: i32) -> (i32, i32) {
    %c0_i32 = arith.constant 0 : i32
    return %arg0, %arg2 : i32, i32
  }
  func.func @transform_1(%arg0: i32, %arg1: i32, %arg2: i32) -> (i32, i32) {
    %c0_i32 = arith.constant 0 : i32
    return %arg2, %arg1 : i32, i32
  }
  func.func @transform_2(%arg0: i32, %arg1: i32, %arg2: i32) -> (i32, i32) {
    %c0_i32 = arith.constant 0 : i32
    %c0_i32_0 = arith.constant 0 : i32
    return %c0_i32, %arg2 : i32, i32
  }
  func.func @transform_3(%arg0: i32, %arg1: i32, %arg2: i32) -> (i32, i32) {
    %c0_i32 = arith.constant 0 : i32
    %c0_i32_0 = arith.constant 0 : i32
    return %c0_i32, %arg2 : i32, i32
  }
  func.func @transform_4(%arg0: i32, %arg1: i32, %arg2: i32) -> (i32, i32) {
    %c0_i32 = arith.constant 0 : i32
    return %arg0, %arg1 : i32, i32
  }
}

module attributes {stable_mosaic.version = 11 : i64} {
  func.func @_conv_add_kernel(%arg0: i32, %arg1: i32, %arg2: i32, %arg3: memref<128x128xbf16, #tpu.memory_space<vmem>>, %arg4: memref<128x128xbf16, #tpu.memory_space<vmem>>, %arg5: memref<128x128xbf16, #tpu.memory_space<vmem>>, %arg6: memref<128x128xbf16, #tpu.memory_space<vmem>>, %arg7: memref<128x128xf32, #tpu.memory_space<vmem>>) attributes {dimension_semantics = [#tpu.dimension_semantics<parallel>, #tpu.dimension_semantics<parallel>, #tpu.dimension_semantics<arbitrary>], iteration_bounds = array<i64: 1, 1, 1>, scalar_prefetch = 0 : i64, scratch_operands = 1 : i64, tpu.core_type = #tpu.core_type<tc>, window_params = [{transform_indices = @transform_0, window_bounds = array<i64: 128, 128>}, {transform_indices = @transform_1, window_bounds = array<i64: 128, 128>}, {transform_indices = @transform_2, window_bounds = array<i64: 128, 128>}, {transform_indices = @transform_3, window_bounds = array<i64: 128, 128>}]} {
    %c0_i32 = arith.constant 0 : i32
    %0 = arith.cmpi eq, %arg2, %c0_i32 : i32
    %1 = arith.extui %0 : i1 to i32
    %c0_i32_0 = arith.constant 0 : i32
    %2 = arith.cmpi ne, %1, %c0_i32_0 : i32
    scf.if %2 {
      %cst_10 = arith.constant 0.000000e+00 : f32
      %12 = vector.broadcast %cst_10 : f32 to vector<128x128xf32>
      %c0_11 = arith.constant 0 : index
      %c0_12 = arith.constant 0 : index
      %13 = vector.load %arg7[%c0_11, %c0_12] : memref<128x128xf32, #tpu.memory_space<vmem>>, vector<128x128xf32>
      tpu.vector_store %arg7[%c0_11, %c0_12], %12 {strides = array<i32>} : memref<128x128xf32, #tpu.memory_space<vmem>>, vector<128x128xf32>,
    } else {
    }
    %c0 = arith.constant 0 : index
    %c0_1 = arith.constant 0 : index
    %3 = vector.load %arg7[%c0, %c0_1] : memref<128x128xf32, #tpu.memory_space<vmem>>, vector<128x128xf32>
    %c0_2 = arith.constant 0 : index
    %c0_3 = arith.constant 0 : index
    %4 = vector.load %arg3[%c0_2, %c0_3] : memref<128x128xbf16, #tpu.memory_space<vmem>>, vector<128x128xbf16>
    %c0_4 = arith.constant 0 : index
    %c0_5 = arith.constant 0 : index
    %5 = vector.load %arg4[%c0_4, %c0_5] : memref<128x128xbf16, #tpu.memory_space<vmem>>, vector<128x128xbf16>
    %cst = arith.constant dense<0.000000e+00> : vector<128x128xf32>
    %6 = tpu.matmul %4, %5, %cst {dimension_numbers = #tpu.dot_dimension_numbers<[1], [0], [0], [1], [0, 0, 1, 1], [], []>} : vector<128x128xbf16>, vector<128x128xbf16>, vector<128x128xf32> -> vector<128x128xf32>
    %7 = arith.addf %3, %6 : vector<128x128xf32>
    %c0_6 = arith.constant 0 : index
    %c0_7 = arith.constant 0 : index
    %8 = vector.load %arg7[%c0_6, %c0_7] : memref<128x128xf32, #tpu.memory_space<vmem>>, vector<128x128xf32>
    tpu.vector_store %arg7[%c0_6, %c0_7], %7 {strides = array<i32>} : memref<128x128xf32, #tpu.memory_space<vmem>>, vector<128x128xf32>,
    %c0_i32_8 = arith.constant 0 : i32
    %9 = arith.cmpi eq, %arg2, %c0_i32_8 : i32
    %10 = arith.extui %9 : i1 to i32
    %c0_i32_9 = arith.constant 0 : i32
    %11 = arith.cmpi ne, %10, %c0_i32_9 : i32
    scf.if %11 {
      %c0_10 = arith.constant 0 : index
      %c0_11 = arith.constant 0 : index
      %12 = vector.load %arg7[%c0_10, %c0_11] : memref<128x128xf32, #tpu.memory_space<vmem>>, vector<128x128xf32>
      %c0_12 = arith.constant 0 : index
      %c0_13 = arith.constant 0 : index
      %13 = vector.load %arg5[%c0_12, %c0_13] : memref<128x128xbf16, #tpu.memory_space<vmem>>, vector<128x128xbf16>
      %14 = arith.extf %13 : vector<128x128xbf16> to vector<128x128xf32>
      %15 = arith.addf %12, %14 : vector<128x128xf32>
      %16 = arith.truncf %15 : vector<128x128xf32> to vector<128x128xbf16>
      %c0_14 = arith.constant 0 : index
      %c0_15 = arith.constant 0 : index
      %17 = vector.load %arg6[%c0_14, %c0_15] : memref<128x128xbf16, #tpu.memory_space<vmem>>, vector<128x128xbf16>
      tpu.vector_store %arg6[%c0_14, %c0_15], %16 {strides = array<i32>} : memref<128x128xbf16, #tpu.memory_space<vmem>>, vector<128x128xbf16>,
    } else {
    }
    return
  }
  func.func @transform_0(%arg0: i32, %arg1: i32, %arg2: i32) -> (i32, i32) {
    %c0_i32 = arith.constant 0 : i32
    return %arg0, %arg2 : i32, i32
  }
  func.func @transform_1(%arg0: i32, %arg1: i32, %arg2: i32) -> (i32, i32) {
    %c0_i32 = arith.constant 0 : i32
    return %arg2, %arg1 : i32, i32
  }
  func.func @transform_2(%arg0: i32, %arg1: i32, %arg2: i32) -> (i32, i32) {
    %c0_i32 = arith.constant 0 : i32
    return %arg0, %arg1 : i32, i32
  }
  func.func @transform_3(%arg0: i32, %arg1: i32, %arg2: i32) -> (i32, i32) {
    %c0_i32 = arith.constant 0 : i32
    return %arg0, %arg1 : i32, i32
  }
}

</mosaic_0001>

<bundles_post_ra>
// kernel: tile.23
= control target key start
LH: loop header
LB: loop body
LE: loop exit
PB: predicated region body
PF: predicated region fallthrough
CT: control target
= control target key end

     0   :  { %s28_s0 = inlined_call_operand.vmem [shape: f32[4], index: 0, kind: input, shape index: {}]   ;;  %s29_s1 = inlined_call_operand.vmem [shape: f32[9,4], index: 1, kind: output, shape index: {}]  }
   0x1   :  { %v4_v0 = vld [vmem:[%s28_s0] ss:$0 sm:$0xff] }
   0x2   :  { %5 = vst [vmem:[%s29_s1] sm:$0xff] %v4_v0 }
   0x3   :  { %8 = vst [vmem:[%s29_s1 + $0x8] sm:$0xff] %v4_v0 }

// kernel: tile.24
= control target key start
LH: loop header
LB: loop body
LE: loop exit
PB: predicated region body
PF: predicated region fallthrough
CT: control target
= control target key end

     0   :  { %s75_s10 = smov 32   ;;  %s76_s11 = smov 24   ;;  %vm3_vm0 = vcmask 31744   ;;  %vm9_vm1 = vcmask 294144   ;;  %vm15_vm2 = vcmask 261344   ;;  %vm21_vm3 = vcmask 228544   ;;  %s123_s0 = inlined_call_operand.vmem [shape: f32[9,4], index: 0, kind: input, shape index: {}]   ;;  %s124_s1 = inlined_call_operand.vmem [shape: f32[36], index: 1, kind: output, shape index: {}]  }
   0x1   :  { %v59_v0 = vld [vmem:[%s123_s0 + $0x8] sm:$0x1]   ;;  %v61_v1 = vld [vmem:[%s123_s0 + $0x6] sm:$0x1]   ;;  %v63_v2 = vld [vmem:[%s123_s0 + $0x4] sm:$0x1]  }
   0x2   :  { %7 = vrot.lane.b32.xlu0 %v59_v0, %s75_s10  ;;  %19 = vrot.lane.b32.xlu1 %v61_v1, %s76_s11  ;;  %s77_s14 = smov 16   ;;  %v60_v3 = vld [vmem:[%s123_s0 + $0x7] sm:$0x1]   ;;  %v62_v4 = vld [vmem:[%s123_s0 + $0x5] sm:$0x1]   ;;  %s78_s19 = smov 28  }
   0x3   :  { %31 = vrot.lane.b32.xlu2 %v63_v2, %s77_s14  ;;  %s79_s20 = smov 20   ;;  %v64_v5 = vld [vmem:[%s123_s0 + $0x3] sm:$0x1]   ;;  %s80_s23 = smov 12   ;;  %v65_v6 = vld [vmem:[%s123_s0 + $0x2] sm:$0x1]  }
   0x4   :  { %v66_v7 = vld [vmem:[%s123_s0 + $0x1] sm:$0x1]   ;;  %s81_s28 = smov 8   ;;  %s82_s29 = smov 4   ;;  %v2_v8 = vld [vmem:[%s123_s0] sm:$0x1]  }
   0x5   :  { %4 = vst.msk [vmem:[#allocation0] sm:$0x1] %vm3_vm0, %v2_v8   ;;  %vm27_vm4 = vcmask 195744   ;;  %vm33_vm5 = vcmask 162944   ;;  %vm39_vm6 = vcmask 130144   ;;  %vm45_vm7 = vcmask 97344  }
   0x6   :  { %vm51_vm8 = vcmask 64544  }
   0xa   :  { %13 = vrot.lane.b32.xlu0 %v60_v3, %s78_s19  ;;  %25 = vrot.lane.b32.xlu1 %v62_v4, %s79_s20 }
   0xb   :  { %37 = vrot.lane.b32.xlu2 %v64_v5, %s80_s23 }
  0x12   :  { %43 = vrot.lane.b32.xlu0 %v65_v6, %s81_s28  ;;  %49 = vrot.lane.b32.xlu1 %v66_v7, %s82_s29 }
  0x5d   :  { %v32_v9 = vpop.permute.xlu2 %31  }
  0x65   :  { %v38_v10 = vpop.permute.xlu2 %37  }
  0x74   :  { %v8_v11 = vpop.permute.xlu0 %7   ;;  %v20_v12 = vpop.permute.xlu1 %19  }
  0x75   :  { %10 = vst.msk [vmem:[#allocation0] sm:$0x1] %vm9_vm1, %v8_v11  }
  0x7c   :  { %v14_v13 = vpop.permute.xlu0 %13   ;;  %v26_v14 = vpop.permute.xlu1 %25  }
  0x7d   :  { %16 = vst.msk [vmem:[#allocation0] sm:$0x1] %vm15_vm2, %v14_v13  }
  0x7e   :  { %22 = vst.msk [vmem:[#allocation0] sm:$0x1] %vm21_vm3, %v20_v12  }
  0x7f   :  { %28 = vst.msk [vmem:[#allocation0] sm:$0x1] %vm27_vm4, %v26_v14  }
  0x80   :  { %34 = vst.msk [vmem:[#allocation0] sm:$0x1] %vm33_vm5, %v32_v9  }
  0x81   :  { %40 = vst.msk [vmem:[#allocation0] sm:$0x1] %vm39_vm6, %v38_v10  }
  0x84   :  { %v44_v15 = vpop.permute.xlu0 %43   ;;  %v50_v16 = vpop.permute.xlu1 %49  }
  0x85   :  { %46 = vst.msk [vmem:[#allocation0] sm:$0x1] %vm45_vm7, %v44_v15  }
  0x86   :  { %52 = vst.msk [vmem:[#allocation0] sm:$0x1] %vm51_vm8, %v50_v16  }
  0x8d   :  { %v55_v17 = vld [vmem:[#allocation0] sm:$0x1] }
  0x8e   :  { %58 = vst [vmem:[%s124_s1] sm:$0x1] %v55_v17 }

// kernel: network_block_forward.5
= control target key start
LH: loop header
LB: loop body
LE: loop exit
PB: predicated region body
PF: predicated region fallthrough
CT: control target
= control target key end

     0   :  { %s756_s1 = inlined_call_operand.vmem [shape: bf16[128,128], index: 1, kind: input, shape index: {}]   ;;  %s757_s2 = inlined_call_operand.vmem [shape: f32[1,128], index: 2, kind: input, shape index: {}]   ;;  %s758_s3 = inlined_call_operand.vmem [shape: f32[1,128], index: 3, kind: input, shape index: {}]   ;;  %s759_s4 = inlined_call_operand.vmem [shape: f32[1,128], index: 4, kind: input, shape index: {}]   ;;  %s760_s5 = inlined_call_operand.vmem [shape: f32[1,128], index: 5, kind: input, shape index: {}]   ;;  %s761_s0 = inlined_call_operand.vmem [shape: bf16[128,128], index: 0, kind: input, shape index: {}]   ;;  %s762_s6 = inlined_call_operand.vmem [shape: bf16[128,128], index: 6, kind: output, shape index: {}]  }
   0x1   :  { %v450_v0 = vld [vmem:[%s756_s1 + $0x38] sm:$0xff]  ;;  %v449_v1 = vld [vmem:[%s756_s1 + $0x30] sm:$0xff]  ;;  %v448_v2 = vld [vmem:[%s756_s1 + $0x28] sm:$0xff] }
   0x2   :  { %219 = vmatpush.bf16.msra.mxu0 %v450_v0  ;;  %537 = vmatpush.bf16.msra.mxu1 %v450_v0  ;;  %v452_v3 = vld [vmem:[%s761_s0] sm:$0xff]   ;;  %v524_v5 = vld [vmem:[%s761_s0 + $0x10] sm:$0xff]   ;;  %v446_v15 = vld [vmem:[%s756_s1 + $0x18] sm:$0xff] }
   0x3   :  { %538 = vmatpush.bf16.msra.mxu2 %v450_v0  ;;  %539 = vmatpush.bf16.msra.mxu3 %v450_v0  ;;  %v447_v4 = vld [vmem:[%s756_s1 + $0x20] sm:$0xff]  ;;  %v528_v7 = vld [vmem:[%s761_s0 + $0x30] sm:$0xff]   ;;  %v453_v8 = vunpack.c.l.bf16 %v452_v3  ;;  %v454_v9 = vunpack.c.h.bf16 %v452_v3  ;;  %v461_v11 = vunpack.c.l.bf16 %v524_v5  ;;  %v462_v12 = vunpack.c.h.bf16 %v524_v5  ;;  %v444_v34 = vld [vmem:[%s756_s1 + $0x8] sm:$0xff] }
   0x4   :  { %v526_v6 = vld [vmem:[%s761_s0 + $0x20] sm:$0xff]   ;;  %v477_v16 = vunpack.c.l.bf16 %v528_v7  ;;  %v478_v17 = vunpack.c.h.bf16 %v528_v7  ;;  %v445_v25 = vld [vmem:[%s756_s1 + $0x10] sm:$0xff]  ;;  %v523_v43 = vld [vmem:[%s761_s0 + $0x8] sm:$0xff]  }
   0x5   :  { %v627_v10 = vld [vmem:[%s757_s2] ss:$0 sm:$0xff]  ;;  %v469_v13 = vunpack.c.l.bf16 %v526_v6  ;;  %v470_v14 = vunpack.c.h.bf16 %v526_v6  ;;  %v525_v44 = vld [vmem:[%s761_s0 + $0x18] sm:$0xff]   ;;  %v527_v48 = vld [vmem:[%s761_s0 + $0x28] sm:$0xff]   ;;  %v457_v51 = vunpack.c.l.bf16 %v523_v43  ;;  %v458_v52 = vunpack.c.h.bf16 %v523_v43 }
   0x6   :  { %220 = vmatpush.bf16.msra.mxu0 %v449_v1  ;;  %540 = vmatpush.bf16.msra.mxu1 %v449_v1  ;;  %v79_v18 = vmul.f32 %v627_v10, %v453_v8  ;;  %v80_v19 = vmul.f32 %v627_v10, %v454_v9  ;;  %v637_v20 = vld [vmem:[%s758_s3] ss:$0 sm:$0xff]  ;;  %v83_v21 = vmul.f32 %v627_v10, %v461_v11  ;;  %v529_v49 = vld [vmem:[%s761_s0 + $0x38] sm:$0xff]   ;;  %v465_v53 = vunpack.c.l.bf16 %v525_v44 }
   0x7   :  { %541 = vmatpush.bf16.msra.mxu2 %v449_v1  ;;  %542 = vmatpush.bf16.msra.mxu3 %v449_v1  ;;  %v84_v22 = vmul.f32 %v627_v10, %v462_v12  ;;  %v87_v23 = vmul.f32 %v627_v10, %v469_v13  ;;  %v88_v24 = vmul.f32 %v627_v10, %v470_v14  ;;  %v443_v45 = vld [vmem:[%s756_s1] sm:$0xff]  ;;  %v466_v56 = vunpack.c.h.bf16 %v525_v44 }
   0x8   :  { %v91_v26 = vmul.f32 %v627_v10, %v477_v16  ;;  %v92_v27 = vmul.f32 %v627_v10, %v478_v17  ;;  %v99_v28 = vadd.f32 %v637_v20, %v79_v18  ;;  %v100_v29 = vadd.f32 %v637_v20, %v80_v19 }
   0x9   :  { %v103_v30 = vadd.f32 %v637_v20, %v83_v21  ;;  %v104_v31 = vadd.f32 %v637_v20, %v84_v22  ;;  %v107_v32 = vadd.f32 %v637_v20, %v87_v23  ;;  %v108_v33 = vadd.f32 %v637_v20, %v88_v24 }
   0xa   :  { %221 = vmatpush.bf16.msra.mxu0 %v448_v2  ;;  %543 = vmatpush.bf16.msra.mxu1 %v448_v2  ;;  %v111_v35 = vadd.f32 %v637_v20, %v91_v26  ;;  %v112_v36 = vadd.f32 %v637_v20, %v92_v27  ;;  %v115_v37 = vmax.f32 %v99_v28, 0.0  ;;  %v116_v38 = vmax.f32 %v100_v29, 0.0 }
   0xb   :  { %544 = vmatpush.bf16.msra.mxu2 %v448_v2  ;;  %545 = vmatpush.bf16.msra.mxu3 %v448_v2  ;;  %v119_v39 = vmax.f32 %v103_v30, 0.0  ;;  %v120_v40 = vmax.f32 %v104_v31, 0.0  ;;  %v123_v41 = vmax.f32 %v107_v32, 0.0  ;;  %v124_v42 = vmax.f32 %v108_v33, 0.0  ;;  %v699_v30 = vld [vmem:[%s760_s5] ss:$0 sm:$0xff] }
   0xc   :  { %v127_v46 = vmax.f32 %v111_v35, 0.0  ;;  %v128_v47 = vmax.f32 %v112_v36, 0.0  ;;  %v147_v50 = vpack.c.bf16 %v116_v38, %v115_v37  ;;  %v473_v57 = vunpack.c.l.bf16 %v527_v48 }
   0xd   :  { %v149_v54 = vpack.c.bf16 %v120_v40, %v119_v39  ;;  %v151_v55 = vpack.c.bf16 %v124_v42, %v123_v41  ;;  %v474_v59 = vunpack.c.h.bf16 %v527_v48  ;;  %v481_v60 = vunpack.c.l.bf16 %v529_v49 }
   0xe   :  { %222 = vmatpush.bf16.msra.mxu0 %v447_v4  ;;  %546 = vmatpush.bf16.msra.mxu1 %v447_v4  ;;  %v153_v58 = vpack.c.bf16 %v128_v47, %v127_v46  ;;  %v482_v61 = vunpack.c.h.bf16 %v529_v49  ;;  %v81_v62 = vmul.f32 %v627_v10, %v457_v51  ;;  %v82_v63 = vmul.f32 %v627_v10, %v458_v52 }
   0xf   :  { %547 = vmatpush.bf16.msra.mxu2 %v447_v4  ;;  %548 = vmatpush.bf16.msra.mxu3 %v447_v4  ;;  %v85_v0 = vmul.f32 %v627_v10, %v465_v53  ;;  %v86_v1 = vmul.f32 %v627_v10, %v466_v56  ;;  %v89_v2 = vmul.f32 %v627_v10, %v473_v57 }
  0x10   :  { %v90_v3 = vmul.f32 %v627_v10, %v474_v59  ;;  %v93_v4 = vmul.f32 %v627_v10, %v481_v60  ;;  %v94_v5 = vmul.f32 %v627_v10, %v482_v61  ;;  %v101_v6 = vadd.f32 %v637_v20, %v81_v62 }
  0x11   :  { %v102_v7 = vadd.f32 %v637_v20, %v82_v63  ;;  %v105_v8 = vadd.f32 %v637_v20, %v85_v0  ;;  %v106_v9 = vadd.f32 %v637_v20, %v86_v1  ;;  %v109_v11 = vadd.f32 %v637_v20, %v89_v2 }
  0x12   :  { %223 = vmatpush.bf16.msra.mxu0 %v446_v15  ;;  %549 = vmatpush.bf16.msra.mxu1 %v446_v15  ;;  %v110_v12 = vadd.f32 %v637_v20, %v90_v3  ;;  %v113_v13 = vadd.f32 %v637_v20, %v93_v4  ;;  %v114_v14 = vadd.f32 %v637_v20, %v94_v5  ;;  %v693_v20 = vld [vmem:[%s759_s4] ss:$0 sm:$0xff] }
  0x13   :  { %550 = vmatpush.bf16.msra.mxu2 %v446_v15  ;;  %551 = vmatpush.bf16.msra.mxu3 %v446_v15  ;;  %v117_v15 = vmax.f32 %v101_v6, 0.0  ;;  %v118_v16 = vmax.f32 %v102_v7, 0.0  ;;  %v121_v17 = vmax.f32 %v105_v8, 0.0  ;;  %v122_v10 = vmax.f32 %v106_v9, 0.0 }
  0x14   :  { %v125_v18 = vmax.f32 %v109_v11, 0.0  ;;  %v126_v19 = vmax.f32 %v110_v12, 0.0  ;;  %v129_v21 = vmax.f32 %v113_v13, 0.0  ;;  %v130_v22 = vmax.f32 %v114_v14, 0.0 }
  0x15   :  { %v148_v23 = vpack.c.bf16 %v118_v16, %v117_v15  ;;  %v150_v24 = vpack.c.bf16 %v122_v10, %v121_v17 }
  0x16   :  { %224 = vmatpush.bf16.msra.mxu0 %v445_v25  ;;  %552 = vmatpush.bf16.msra.mxu1 %v445_v25  ;;  %v154_v26 = vpack.c.bf16 %v130_v22, %v129_v21 }
  0x17   :  { %553 = vmatpush.bf16.msra.mxu2 %v445_v25  ;;  %554 = vmatpush.bf16.msra.mxu3 %v445_v25  ;;  %v152_v25 = vpack.c.bf16 %v126_v19, %v125_v18 }
  0x1a   :  { %225 = vmatpush.bf16.msra.mxu0 %v444_v34  ;;  %555 = vmatpush.bf16.msra.mxu1 %v444_v34 }
  0x1b   :  { %556 = vmatpush.bf16.msra.mxu2 %v444_v34  ;;  %557 = vmatpush.bf16.msra.mxu3 %v444_v34 }
  0x1e   :  { %226 = vmatpush.bf16.msra.mxu0 %v443_v45  ;;  %558 = vmatpush.bf16.msra.mxu1 %v443_v45 }
  0x1f   :  { %559 = vmatpush.bf16.msra.mxu2 %v443_v45  ;;  %560 = vmatpush.bf16.msra.mxu3 %v443_v45 }
  0x21   :  { %227 = vmatmul.bf16.vlgmr.msra.gmra.mxu0 %v147_v50  ;;  %237 = vmatmul.bf16.vlgmr.msra.gmra.mxu1 %v149_v54 }
  0x22   :  { %247 = vmatmul.bf16.vlgmr.msra.gmra.mxu2 %v151_v55  ;;  %257 = vmatmul.bf16.vlgmr.msra.gmra.mxu3 %v153_v58 }
  0x31   :  { %232 = vmatmul.bf16.gmra.mxu0 %v148_v23  ;;  %242 = vmatmul.bf16.gmra.mxu1 %v150_v24 }
  0x32   :  { %252 = vmatmul.bf16.gmra.mxu2 %v152_v25  ;;  %262 = vmatmul.bf16.gmra.mxu3 %v154_v26 }
  0x9e   :  { %v228_v27 = vpop.f32.mrf.mxu0  ;;  %v238_v28 = vpop.f32.mrf.mxu1 }
  0x9f   :  { %v323_v29 = vmul.f32 %v693_v20, %v228_v27  ;;  %v327_v31 = vmul.f32 %v693_v20, %v238_v28 }
  0xa1   :  { %v343_v36 = vadd.f32 %v699_v30, %v323_v29  ;;  %v347_v37 = vadd.f32 %v699_v30, %v327_v31 }
  0xa3   :  { %v359_v44 = vmax.f32 %v343_v36, 0.0  ;;  %v363_v45 = vmax.f32 %v347_v37, 0.0 }
  0xa5   :  { %v248_v32 = vpop.f32.mrf.mxu2  ;;  %v258_v33 = vpop.f32.mrf.mxu3 }
  0xa6   :  { %v230_v34 = vpop.f32.mrf.mxu0  ;;  %v240_v35 = vpop.f32.mrf.mxu1  ;;  %v331_v42 = vmul.f32 %v693_v20, %v248_v32  ;;  %v335_v43 = vmul.f32 %v693_v20, %v258_v33 }
  0xa7   :  { %v324_v38 = vmul.f32 %v693_v20, %v230_v34  ;;  %v328_v39 = vmul.f32 %v693_v20, %v240_v35 }
  0xa8   :  { %v351_v52 = vadd.f32 %v699_v30, %v331_v42  ;;  %v355_v53 = vadd.f32 %v699_v30, %v335_v43 }
  0xa9   :  { %v344_v40 = vadd.f32 %v699_v30, %v324_v38  ;;  %v348_v41 = vadd.f32 %v699_v30, %v328_v39 }
  0xaa   :  { %v367_v60 = vmax.f32 %v351_v52, 0.0  ;;  %v371_v61 = vmax.f32 %v355_v53, 0.0 }
  0xab   :  { %v360_v46 = vmax.f32 %v344_v40, 0.0  ;;  %v364_v47 = vmax.f32 %v348_v41, 0.0 }
  0xad   :  { %v486_v48 = vpack.c.bf16 %v360_v46, %v359_v44  ;;  %v496_v49 = vpack.c.bf16 %v364_v47, %v363_v45  ;;  %v250_v50 = vpop.f32.mrf.mxu2  ;;  %v260_v51 = vpop.f32.mrf.mxu3 }
  0xae   :  { %v332_v54 = vmul.f32 %v693_v20, %v250_v50  ;;  %v336_v55 = vmul.f32 %v693_v20, %v260_v51  ;;  %v233_v56 = vpop.f32.mrf.mxu0  ;;  %v243_v57 = vpop.f32.mrf.mxu1 }
  0xaf   :  { %487 = vst [vmem:[%s762_s6] sm:$0xff] %v486_v48   ;;  %v325_v0 = vmul.f32 %v693_v20, %v233_v56  ;;  %v329_v1 = vmul.f32 %v693_v20, %v243_v57 }
  0xb0   :  { %531 = vst [vmem:[%s762_s6 + $0x10] sm:$0xff] %v496_v49   ;;  %v352_v58 = vadd.f32 %v699_v30, %v332_v54  ;;  %v356_v59 = vadd.f32 %v699_v30, %v336_v55 }
  0xb1   :  { %v345_v8 = vadd.f32 %v699_v30, %v325_v0  ;;  %v349_v9 = vadd.f32 %v699_v30, %v329_v1 }
  0xb2   :  { %v368_v62 = vmax.f32 %v352_v58, 0.0  ;;  %v372_v63 = vmax.f32 %v356_v59, 0.0 }
  0xb3   :  { %v361_v17 = vmax.f32 %v345_v8, 0.0  ;;  %v365_v10 = vmax.f32 %v349_v9, 0.0 }
  0xb4   :  { %v506_v2 = vpack.c.bf16 %v368_v62, %v367_v60  ;;  %v516_v3 = vpack.c.bf16 %v372_v63, %v371_v61 }
  0xb5   :  { %v253_v4 = vpop.f32.mrf.mxu2  ;;  %v263_v5 = vpop.f32.mrf.mxu3 }
  0xb6   :  { %533 = vst [vmem:[%s762_s6 + $0x20] sm:$0xff] %v506_v2   ;;  %v235_v6 = vpop.f32.mrf.mxu0  ;;  %v245_v7 = vpop.f32.mrf.mxu1  ;;  %v333_v15 = vmul.f32 %v693_v20, %v253_v4  ;;  %v337_v16 = vmul.f32 %v693_v20, %v263_v5 }
  0xb7   :  { %535 = vst [vmem:[%s762_s6 + $0x30] sm:$0xff] %v516_v3   ;;  %v326_v11 = vmul.f32 %v693_v20, %v235_v6  ;;  %v330_v12 = vmul.f32 %v693_v20, %v245_v7 }
  0xb8   :  { %v353_v25 = vadd.f32 %v699_v30, %v333_v15  ;;  %v357_v26 = vadd.f32 %v699_v30, %v337_v16 }
  0xb9   :  { %v346_v13 = vadd.f32 %v699_v30, %v326_v11  ;;  %v350_v14 = vadd.f32 %v699_v30, %v330_v12 }
  0xba   :  { %v369_v32 = vmax.f32 %v353_v25, 0.0  ;;  %v373_v33 = vmax.f32 %v357_v26, 0.0 }
  0xbb   :  { %v362_v18 = vmax.f32 %v346_v13, 0.0  ;;  %v366_v19 = vmax.f32 %v350_v14, 0.0 }
  0xbd   :  { %v491_v21 = vpack.c.bf16 %v362_v18, %v361_v17  ;;  %v501_v22 = vpack.c.bf16 %v366_v19, %v365_v10  ;;  %v255_v23 = vpop.f32.mrf.mxu2  ;;  %v265_v24 = vpop.f32.mrf.mxu3 }
  0xbe   :  { %v334_v27 = vmul.f32 %v693_v20, %v255_v23  ;;  %v338_v28 = vmul.f32 %v693_v20, %v265_v24 }
  0xbf   :  { %530 = vst [vmem:[%s762_s6 + $0x8] sm:$0xff] %v491_v21  }
  0xc0   :  { %532 = vst [vmem:[%s762_s6 + $0x18] sm:$0xff] %v501_v22   ;;  %v354_v29 = vadd.f32 %v699_v30, %v334_v27  ;;  %v358_v31 = vadd.f32 %v699_v30, %v338_v28 }
  0xc2   :  { %v370_v34 = vmax.f32 %v354_v29, 0.0  ;;  %v374_v35 = vmax.f32 %v358_v31, 0.0 }
  0xc4   :  { %v511_v36 = vpack.c.bf16 %v370_v34, %v369_v32  ;;  %v521_v37 = vpack.c.bf16 %v374_v35, %v373_v33 }
  0xc6   :  { %534 = vst [vmem:[%s762_s6 + $0x28] sm:$0xff] %v511_v36  }
  0xc7   :  { %536 = vst [vmem:[%s762_s6 + $0x38] sm:$0xff] %v521_v37  }

// kernel: network_block_forward.6
= control target key start
LH: loop header
LB: loop body
LE: loop exit
PB: predicated region body
PF: predicated region fallthrough
CT: control target
= control target key end

     0   :  { %s640_s1 = inlined_call_operand.vmem [shape: bf16[128,128], index: 1, kind: input, shape index: {}]   ;;  %s641_s2 = inlined_call_operand.vmem [shape: f32[1,128], index: 2, kind: input, shape index: {}]   ;;  %s642_s3 = inlined_call_operand.vmem [shape: f32[1,128], index: 3, kind: input, shape index: {}]   ;;  %s643_s0 = inlined_call_operand.vmem [shape: bf16[128,128], index: 0, kind: input, shape index: {}]   ;;  %s644_s4 = inlined_call_operand.vmem [shape: bf16[128,128], index: 4, kind: output, shape index: {}]  }
   0x1   :  { %v388_v0 = vld [vmem:[%s640_s1 + $0x38] sm:$0xff]  ;;  %v387_v1 = vld [vmem:[%s640_s1 + $0x30] sm:$0xff]  ;;  %v386_v2 = vld [vmem:[%s640_s1 + $0x28] sm:$0xff] }
   0x2   :  { %213 = vmatpush.bf16.msra.mxu0 %v388_v0  ;;  %475 = vmatpush.bf16.msra.mxu1 %v388_v0  ;;  %v390_v3 = vld [vmem:[%s643_s0] sm:$0xff]   ;;  %v462_v5 = vld [vmem:[%s643_s0 + $0x10] sm:$0xff]   ;;  %v384_v15 = vld [vmem:[%s640_s1 + $0x18] sm:$0xff] }
   0x3   :  { %476 = vmatpush.bf16.msra.mxu2 %v388_v0  ;;  %477 = vmatpush.bf16.msra.mxu3 %v388_v0  ;;  %v385_v4 = vld [vmem:[%s640_s1 + $0x20] sm:$0xff]  ;;  %v466_v7 = vld [vmem:[%s643_s0 + $0x30] sm:$0xff]   ;;  %v391_v8 = vunpack.c.l.bf16 %v390_v3  ;;  %v392_v9 = vunpack.c.h.bf16 %v390_v3  ;;  %v399_v11 = vunpack.c.l.bf16 %v462_v5  ;;  %v400_v12 = vunpack.c.h.bf16 %v462_v5  ;;  %v382_v34 = vld [vmem:[%s640_s1 + $0x8] sm:$0xff] }
   0x4   :  { %v464_v6 = vld [vmem:[%s643_s0 + $0x20] sm:$0xff]   ;;  %v415_v16 = vunpack.c.l.bf16 %v466_v7  ;;  %v416_v17 = vunpack.c.h.bf16 %v466_v7  ;;  %v383_v25 = vld [vmem:[%s640_s1 + $0x10] sm:$0xff]  ;;  %v461_v43 = vld [vmem:[%s643_s0 + $0x8] sm:$0xff]  }
   0x5   :  { %v553_v10 = vld [vmem:[%s641_s2] ss:$0 sm:$0xff]  ;;  %v407_v13 = vunpack.c.l.bf16 %v464_v6  ;;  %v408_v14 = vunpack.c.h.bf16 %v464_v6  ;;  %v463_v44 = vld [vmem:[%s643_s0 + $0x18] sm:$0xff]   ;;  %v465_v48 = vld [vmem:[%s643_s0 + $0x28] sm:$0xff]   ;;  %v395_v51 = vunpack.c.l.bf16 %v461_v43  ;;  %v396_v52 = vunpack.c.h.bf16 %v461_v43 }
   0x6   :  { %214 = vmatpush.bf16.msra.mxu0 %v387_v1  ;;  %478 = vmatpush.bf16.msra.mxu1 %v387_v1  ;;  %v73_v18 = vmul.f32 %v553_v10, %v391_v8  ;;  %v74_v19 = vmul.f32 %v553_v10, %v392_v9  ;;  %v563_v20 = vld [vmem:[%s642_s3] ss:$0 sm:$0xff]  ;;  %v77_v21 = vmul.f32 %v553_v10, %v399_v11  ;;  %v467_v49 = vld [vmem:[%s643_s0 + $0x38] sm:$0xff]   ;;  %v403_v53 = vunpack.c.l.bf16 %v463_v44 }
   0x7   :  { %479 = vmatpush.bf16.msra.mxu2 %v387_v1  ;;  %480 = vmatpush.bf16.msra.mxu3 %v387_v1  ;;  %v78_v22 = vmul.f32 %v553_v10, %v400_v12  ;;  %v81_v23 = vmul.f32 %v553_v10, %v407_v13  ;;  %v82_v24 = vmul.f32 %v553_v10, %v408_v14  ;;  %v381_v45 = vld [vmem:[%s640_s1] sm:$0xff]  ;;  %v404_v56 = vunpack.c.h.bf16 %v463_v44 }
   0x8   :  { %v85_v26 = vmul.f32 %v553_v10, %v415_v16  ;;  %v86_v27 = vmul.f32 %v553_v10, %v416_v17  ;;  %v93_v28 = vadd.f32 %v563_v20, %v73_v18  ;;  %v94_v29 = vadd.f32 %v563_v20, %v74_v19 }
   0x9   :  { %v97_v30 = vadd.f32 %v563_v20, %v77_v21  ;;  %v98_v31 = vadd.f32 %v563_v20, %v78_v22  ;;  %v101_v32 = vadd.f32 %v563_v20, %v81_v23  ;;  %v102_v33 = vadd.f32 %v563_v20, %v82_v24 }
   0xa   :  { %215 = vmatpush.bf16.msra.mxu0 %v386_v2  ;;  %481 = vmatpush.bf16.msra.mxu1 %v386_v2  ;;  %v105_v35 = vadd.f32 %v563_v20, %v85_v26  ;;  %v106_v36 = vadd.f32 %v563_v20, %v86_v27  ;;  %v109_v37 = vmax.f32 %v93_v28, 0.0  ;;  %v110_v38 = vmax.f32 %v94_v29, 0.0 }
   0xb   :  { %482 = vmatpush.bf16.msra.mxu2 %v386_v2  ;;  %483 = vmatpush.bf16.msra.mxu3 %v386_v2  ;;  %v113_v39 = vmax.f32 %v97_v30, 0.0  ;;  %v114_v40 = vmax.f32 %v98_v31, 0.0  ;;  %v117_v41 = vmax.f32 %v101_v32, 0.0  ;;  %v118_v42 = vmax.f32 %v102_v33, 0.0 }
   0xc   :  { %v121_v46 = vmax.f32 %v105_v35, 0.0  ;;  %v122_v47 = vmax.f32 %v106_v36, 0.0  ;;  %v141_v50 = vpack.c.bf16 %v110_v38, %v109_v37  ;;  %v411_v57 = vunpack.c.l.bf16 %v465_v48 }
   0xd   :  { %v143_v54 = vpack.c.bf16 %v114_v40, %v113_v39  ;;  %v145_v55 = vpack.c.bf16 %v118_v42, %v117_v41  ;;  %v412_v59 = vunpack.c.h.bf16 %v465_v48  ;;  %v419_v60 = vunpack.c.l.bf16 %v467_v49 }
   0xe   :  { %216 = vmatpush.bf16.msra.mxu0 %v385_v4  ;;  %484 = vmatpush.bf16.msra.mxu1 %v385_v4  ;;  %v147_v58 = vpack.c.bf16 %v122_v47, %v121_v46  ;;  %v420_v61 = vunpack.c.h.bf16 %v467_v49  ;;  %v75_v62 = vmul.f32 %v553_v10, %v395_v51  ;;  %v76_v63 = vmul.f32 %v553_v10, %v396_v52 }
   0xf   :  { %485 = vmatpush.bf16.msra.mxu2 %v385_v4  ;;  %486 = vmatpush.bf16.msra.mxu3 %v385_v4  ;;  %v79_v0 = vmul.f32 %v553_v10, %v403_v53  ;;  %v80_v1 = vmul.f32 %v553_v10, %v404_v56  ;;  %v83_v2 = vmul.f32 %v553_v10, %v411_v57 }
  0x10   :  { %v84_v3 = vmul.f32 %v553_v10, %v412_v59  ;;  %v87_v4 = vmul.f32 %v553_v10, %v419_v60  ;;  %v88_v5 = vmul.f32 %v553_v10, %v420_v61  ;;  %v95_v6 = vadd.f32 %v563_v20, %v75_v62 }
  0x11   :  { %v96_v7 = vadd.f32 %v563_v20, %v76_v63  ;;  %v99_v8 = vadd.f32 %v563_v20, %v79_v0  ;;  %v100_v9 = vadd.f32 %v563_v20, %v80_v1  ;;  %v103_v11 = vadd.f32 %v563_v20, %v83_v2 }
  0x12   :  { %217 = vmatpush.bf16.msra.mxu0 %v384_v15  ;;  %487 = vmatpush.bf16.msra.mxu1 %v384_v15  ;;  %v104_v12 = vadd.f32 %v563_v20, %v84_v3  ;;  %v107_v13 = vadd.f32 %v563_v20, %v87_v4  ;;  %v108_v14 = vadd.f32 %v563_v20, %v88_v5 }
  0x13   :  { %488 = vmatpush.bf16.msra.mxu2 %v384_v15  ;;  %489 = vmatpush.bf16.msra.mxu3 %v384_v15  ;;  %v111_v15 = vmax.f32 %v95_v6, 0.0  ;;  %v112_v16 = vmax.f32 %v96_v7, 0.0  ;;  %v115_v17 = vmax.f32 %v99_v8, 0.0  ;;  %v116_v10 = vmax.f32 %v100_v9, 0.0 }
  0x14   :  { %v119_v18 = vmax.f32 %v103_v11, 0.0  ;;  %v120_v19 = vmax.f32 %v104_v12, 0.0  ;;  %v123_v21 = vmax.f32 %v107_v13, 0.0  ;;  %v124_v22 = vmax.f32 %v108_v14, 0.0 }
  0x15   :  { %v142_v23 = vpack.c.bf16 %v112_v16, %v111_v15  ;;  %v144_v24 = vpack.c.bf16 %v116_v10, %v115_v17 }
  0x16   :  { %218 = vmatpush.bf16.msra.mxu0 %v383_v25  ;;  %490 = vmatpush.bf16.msra.mxu1 %v383_v25  ;;  %v148_v26 = vpack.c.bf16 %v124_v22, %v123_v21 }
  0x17   :  { %491 = vmatpush.bf16.msra.mxu2 %v383_v25  ;;  %492 = vmatpush.bf16.msra.mxu3 %v383_v25  ;;  %v146_v25 = vpack.c.bf16 %v120_v19, %v119_v18 }
  0x1a   :  { %219 = vmatpush.bf16.msra.mxu0 %v382_v34  ;;  %493 = vmatpush.bf16.msra.mxu1 %v382_v34 }
  0x1b   :  { %494 = vmatpush.bf16.msra.mxu2 %v382_v34  ;;  %495 = vmatpush.bf16.msra.mxu3 %v382_v34 }
  0x1e   :  { %220 = vmatpush.bf16.msra.mxu0 %v381_v45  ;;  %496 = vmatpush.bf16.msra.mxu1 %v381_v45 }
  0x1f   :  { %497 = vmatpush.bf16.msra.mxu2 %v381_v45  ;;  %498 = vmatpush.bf16.msra.mxu3 %v381_v45 }
  0x21   :  { %221 = vmatmul.bf16.vlgmr.msra.gmra.mxu0 %v141_v50  ;;  %231 = vmatmul.bf16.vlgmr.msra.gmra.mxu1 %v143_v54 }
  0x22   :  { %241 = vmatmul.bf16.vlgmr.msra.gmra.mxu2 %v145_v55  ;;  %251 = vmatmul.bf16.vlgmr.msra.gmra.mxu3 %v147_v58 }
  0x31   :  { %226 = vmatmul.bf16.gmra.mxu0 %v142_v23  ;;  %236 = vmatmul.bf16.gmra.mxu1 %v144_v24 }
  0x32   :  { %246 = vmatmul.bf16.gmra.mxu2 %v146_v25  ;;  %256 = vmatmul.bf16.gmra.mxu3 %v148_v26 }
  0x9e   :  { %v222_v27 = vpop.f32.mrf.mxu0  ;;  %v232_v28 = vpop.f32.mrf.mxu1 }
  0xa5   :  { %v242_v29 = vpop.f32.mrf.mxu2  ;;  %v252_v20 = vpop.f32.mrf.mxu3 }
  0xa6   :  { %v224_v30 = vpop.f32.mrf.mxu0  ;;  %v234_v31 = vpop.f32.mrf.mxu1 }
  0xa7   :  { %v424_v32 = vpack.c.bf16 %v224_v30, %v222_v27  ;;  %v434_v33 = vpack.c.bf16 %v234_v31, %v232_v28 }
  0xa9   :  { %425 = vst [vmem:[%s644_s4] sm:$0xff] %v424_v32  }
  0xaa   :  { %469 = vst [vmem:[%s644_s4 + $0x10] sm:$0xff] %v434_v33  }
  0xad   :  { %v244_v34 = vpop.f32.mrf.mxu2  ;;  %v254_v35 = vpop.f32.mrf.mxu3 }
  0xae   :  { %v444_v36 = vpack.c.bf16 %v244_v34, %v242_v29  ;;  %v454_v37 = vpack.c.bf16 %v254_v35, %v252_v20  ;;  %v227_v38 = vpop.f32.mrf.mxu0  ;;  %v237_v39 = vpop.f32.mrf.mxu1 }
  0xb0   :  { %471 = vst [vmem:[%s644_s4 + $0x20] sm:$0xff] %v444_v36  }
  0xb1   :  { %473 = vst [vmem:[%s644_s4 + $0x30] sm:$0xff] %v454_v37  }
  0xb5   :  { %v247_v40 = vpop.f32.mrf.mxu2  ;;  %v257_v41 = vpop.f32.mrf.mxu3 }
  0xb6   :  { %v229_v42 = vpop.f32.mrf.mxu0  ;;  %v239_v43 = vpop.f32.mrf.mxu1 }
  0xb7   :  { %v429_v44 = vpack.c.bf16 %v229_v42, %v227_v38  ;;  %v439_v45 = vpack.c.bf16 %v239_v43, %v237_v39 }
  0xb9   :  { %468 = vst [vmem:[%s644_s4 + $0x8] sm:$0xff] %v429_v44  }
  0xba   :  { %470 = vst [vmem:[%s644_s4 + $0x18] sm:$0xff] %v439_v45  }
  0xbd   :  { %v249_v46 = vpop.f32.mrf.mxu2  ;;  %v259_v47 = vpop.f32.mrf.mxu3 }
  0xbe   :  { %v449_v48 = vpack.c.bf16 %v249_v46, %v247_v40  ;;  %v459_v49 = vpack.c.bf16 %v259_v47, %v257_v41 }
  0xc0   :  { %472 = vst [vmem:[%s644_s4 + $0x28] sm:$0xff] %v449_v48  }
  0xc1   :  { %474 = vst [vmem:[%s644_s4 + $0x38] sm:$0xff] %v459_v49  }

// kernel: tile.33
= control target key start
LH: loop header
LB: loop body
LE: loop exit
PB: predicated region body
PF: predicated region fallthrough
CT: control target
= control target key end

     0   :  { %s28_s0 = inlined_call_operand.vmem [shape: f32[8], index: 0, kind: input, shape index: {}]   ;;  %s29_s1 = inlined_call_operand.vmem [shape: f32[9,8], index: 1, kind: output, shape index: {}]  }
   0x1   :  { %v4_v0 = vld [vmem:[%s28_s0] ss:$0 sm:$0xff] }
   0x2   :  { %5 = vst [vmem:[%s29_s1] sm:$0xff] %v4_v0 }
   0x3   :  { %8 = vst [vmem:[%s29_s1 + $0x8] sm:$0xff] %v4_v0 }

// kernel: tile.34
= control target key start
LH: loop header
LB: loop body
LE: loop exit
PB: predicated region body
PF: predicated region fallthrough
CT: control target
= control target key end

     0   :  { %s75_s10 = smov 64   ;;  %s76_s11 = smov 48   ;;  %vm3_vm0 = vcmask 64512   ;;  %vm9_vm1 = vcmask 589312   ;;  %vm15_vm2 = vcmask 523712   ;;  %vm21_vm3 = vcmask 458112   ;;  %s123_s0 = inlined_call_operand.vmem [shape: f32[9,8], index: 0, kind: input, shape index: {}]   ;;  %s124_s1 = inlined_call_operand.vmem [shape: f32[72], index: 1, kind: output, shape index: {}]  }
   0x1   :  { %v59_v0 = vld [vmem:[%s123_s0 + $0x8] sm:$0x1]   ;;  %v61_v1 = vld [vmem:[%s123_s0 + $0x6] sm:$0x1]   ;;  %v63_v2 = vld [vmem:[%s123_s0 + $0x4] sm:$0x1]  }
   0x2   :  { %7 = vrot.lane.b32.xlu0 %v59_v0, %s75_s10  ;;  %19 = vrot.lane.b32.xlu1 %v61_v1, %s76_s11  ;;  %s77_s14 = smov 32   ;;  %v60_v3 = vld [vmem:[%s123_s0 + $0x7] sm:$0x1]   ;;  %v62_v4 = vld [vmem:[%s123_s0 + $0x5] sm:$0x1]   ;;  %s78_s19 = smov 56  }
   0x3   :  { %31 = vrot.lane.b32.xlu2 %v63_v2, %s77_s14  ;;  %s79_s20 = smov 40   ;;  %v64_v5 = vld [vmem:[%s123_s0 + $0x3] sm:$0x1]   ;;  %s80_s23 = smov 24   ;;  %v65_v6 = vld [vmem:[%s123_s0 + $0x2] sm:$0x1]  }
   0x4   :  { %v66_v7 = vld [vmem:[%s123_s0 + $0x1] sm:$0x1]   ;;  %s81_s28 = smov 16   ;;  %s82_s29 = smov 8   ;;  %v2_v8 = vld [vmem:[%s123_s0] sm:$0x1]  }
   0x5   :  { %4 = vst.msk [vmem:[#allocation0] sm:$0x1] %vm3_vm0, %v2_v8   ;;  %vm27_vm4 = vcmask 392512   ;;  %vm33_vm5 = vcmask 326912   ;;  %vm39_vm6 = vcmask 261312   ;;  %vm45_vm7 = vcmask 195712  }
   0x6   :  { %vm51_vm8 = vcmask 130112  }
   0xa   :  { %13 = vrot.lane.b32.xlu0 %v60_v3, %s78_s19  ;;  %25 = vrot.lane.b32.xlu1 %v62_v4, %s79_s20 }
   0xb   :  { %37 = vrot.lane.b32.xlu2 %v64_v5, %s80_s23 }
  0x12   :  { %43 = vrot.lane.b32.xlu0 %v65_v6, %s81_s28  ;;  %49 = vrot.lane.b32.xlu1 %v66_v7, %s82_s29 }
  0x5d   :  { %v32_v9 = vpop.permute.xlu2 %31  }
  0x65   :  { %v38_v10 = vpop.permute.xlu2 %37  }
  0x74   :  { %v8_v11 = vpop.permute.xlu0 %7   ;;  %v20_v12 = vpop.permute.xlu1 %19  }
  0x75   :  { %10 = vst.msk [vmem:[#allocation0] sm:$0x1] %vm9_vm1, %v8_v11  }
  0x7c   :  { %v14_v13 = vpop.permute.xlu0 %13   ;;  %v26_v14 = vpop.permute.xlu1 %25  }
  0x7d   :  { %16 = vst.msk [vmem:[#allocation0] sm:$0x1] %vm15_vm2, %v14_v13  }
  0x7e   :  { %22 = vst.msk [vmem:[#allocation0] sm:$0x1] %vm21_vm3, %v20_v12  }
  0x7f   :  { %28 = vst.msk [vmem:[#allocation0] sm:$0x1] %vm27_vm4, %v26_v14  }
  0x80   :  { %34 = vst.msk [vmem:[#allocation0] sm:$0x1] %vm33_vm5, %v32_v9  }
  0x81   :  { %40 = vst.msk [vmem:[#allocation0] sm:$0x1] %vm39_vm6, %v38_v10  }
  0x84   :  { %v44_v15 = vpop.permute.xlu0 %43   ;;  %v50_v16 = vpop.permute.xlu1 %49  }
  0x85   :  { %46 = vst.msk [vmem:[#allocation0] sm:$0x1] %vm45_vm7, %v44_v15  }
  0x86   :  { %52 = vst.msk [vmem:[#allocation0] sm:$0x1] %vm51_vm8, %v50_v16  }
  0x8d   :  { %v55_v17 = vld [vmem:[#allocation0] sm:$0x1] }
  0x8e   :  { %58 = vst [vmem:[%s124_s1] sm:$0x1] %v55_v17 }

// kernel: network_block_forward.7
= control target key start
LH: loop header
LB: loop body
LE: loop exit
PB: predicated region body
PF: predicated region fallthrough
CT: control target
= control target key end

     0   :  { %s668_s1 = inlined_call_operand.vmem [shape: bf16[128,128], index: 1, kind: input, shape index: {}]   ;;  %s669_s0 = inlined_call_operand.vmem [shape: bf16[128,128], index: 0, kind: input, shape index: {}]   ;;  %s670_s2 = inlined_call_operand.vmem [shape: bf16[128,128], index: 2, kind: input, shape index: {}]   ;;  %s671_s3 = inlined_call_operand.vmem [shape: bf16[128,128], index: 3, kind: output, shape index: {}]  }
   0x1   :  { %v441_v0 = vld [vmem:[%s668_s1 + $0x38] sm:$0xff]  ;;  %v440_v1 = vld [vmem:[%s668_s1 + $0x30] sm:$0xff]  ;;  %v439_v2 = vld [vmem:[%s668_s1 + $0x28] sm:$0xff] }
   0x2   :  { %178 = vmatpush.bf16.msra.mxu0 %v441_v0  ;;  %528 = vmatpush.bf16.msra.mxu1 %v441_v0  ;;  %v438_v3 = vld [vmem:[%s668_s1 + $0x20] sm:$0xff]  ;;  %v437_v4 = vld [vmem:[%s668_s1 + $0x18] sm:$0xff]  ;;  %v436_v5 = vld [vmem:[%s668_s1 + $0x10] sm:$0xff] }
   0x3   :  { %529 = vmatpush.bf16.msra.mxu2 %v441_v0  ;;  %530 = vmatpush.bf16.msra.mxu3 %v441_v0  ;;  %v435_v6 = vld [vmem:[%s668_s1 + $0x8] sm:$0xff]  ;;  %v434_v7 = vld [vmem:[%s668_s1] sm:$0xff]  ;;  %v428_v9 = vld [vmem:[%s669_s0 + $0x10] sm:$0xff] }
   0x4   :  { %v426_v8 = vld [vmem:[%s669_s0] sm:$0xff]  ;;  %v432_v11 = vld [vmem:[%s669_s0 + $0x30] sm:$0xff]  ;;  %v427_v12 = vld [vmem:[%s669_s0 + $0x8] sm:$0xff] }
   0x5   :  { %v430_v10 = vld [vmem:[%s669_s0 + $0x20] sm:$0xff]  ;;  %v429_v13 = vld [vmem:[%s669_s0 + $0x18] sm:$0xff]  ;;  %v431_v14 = vld [vmem:[%s669_s0 + $0x28] sm:$0xff] }
   0x6   :  { %179 = vmatpush.bf16.msra.mxu0 %v440_v1  ;;  %531 = vmatpush.bf16.msra.mxu1 %v440_v1  ;;  %v433_v15 = vld [vmem:[%s669_s0 + $0x38] sm:$0xff]  ;;  %v443_v18 = vld [vmem:[%s670_s2] sm:$0xff]   ;;  %v515_v19 = vld [vmem:[%s670_s2 + $0x10] sm:$0xff]  }
   0x7   :  { %532 = vmatpush.bf16.msra.mxu2 %v440_v1  ;;  %533 = vmatpush.bf16.msra.mxu3 %v440_v1  ;;  %v444_v20 = vunpack.c.l.bf16 %v443_v18  ;;  %v452_v21 = vunpack.c.l.bf16 %v515_v19  ;;  %v445_v22 = vunpack.c.h.bf16 %v443_v18  ;;  %v453_v23 = vunpack.c.h.bf16 %v515_v19  ;;  %v517_v30 = vld [vmem:[%s670_s2 + $0x20] sm:$0xff]   ;;  %v519_v31 = vld [vmem:[%s670_s2 + $0x30] sm:$0xff]   ;;  %v514_v50 = vld [vmem:[%s670_s2 + $0x8] sm:$0xff]  }
   0x8   :  { %v460_v36 = vunpack.c.l.bf16 %v517_v30  ;;  %v468_v37 = vunpack.c.l.bf16 %v519_v31  ;;  %v461_v38 = vunpack.c.h.bf16 %v517_v30  ;;  %v469_v39 = vunpack.c.h.bf16 %v519_v31  ;;  %v516_v51 = vld [vmem:[%s670_s2 + $0x18] sm:$0xff]   ;;  %v518_v62 = vld [vmem:[%s670_s2 + $0x28] sm:$0xff]  }
   0x9   :  { %v448_v52 = vunpack.c.l.bf16 %v514_v50  ;;  %v456_v53 = vunpack.c.l.bf16 %v516_v51  ;;  %v449_v54 = vunpack.c.h.bf16 %v514_v50  ;;  %v457_v55 = vunpack.c.h.bf16 %v516_v51  ;;  %v520_v63 = vld [vmem:[%s670_s2 + $0x38] sm:$0xff]  }
   0xa   :  { %180 = vmatpush.bf16.msra.mxu0 %v439_v2  ;;  %534 = vmatpush.bf16.msra.mxu1 %v439_v2 }
   0xb   :  { %535 = vmatpush.bf16.msra.mxu2 %v439_v2  ;;  %536 = vmatpush.bf16.msra.mxu3 %v439_v2 }
   0xe   :  { %181 = vmatpush.bf16.msra.mxu0 %v438_v3  ;;  %537 = vmatpush.bf16.msra.mxu1 %v438_v3 }
   0xf   :  { %538 = vmatpush.bf16.msra.mxu2 %v438_v3  ;;  %539 = vmatpush.bf16.msra.mxu3 %v438_v3 }
  0x12   :  { %182 = vmatpush.bf16.msra.mxu0 %v437_v4  ;;  %540 = vmatpush.bf16.msra.mxu1 %v437_v4 }
  0x13   :  { %541 = vmatpush.bf16.msra.mxu2 %v437_v4  ;;  %542 = vmatpush.bf16.msra.mxu3 %v437_v4  ;;  %v464_v4 = vunpack.c.l.bf16 %v518_v62 }
  0x16   :  { %183 = vmatpush.bf16.msra.mxu0 %v436_v5  ;;  %543 = vmatpush.bf16.msra.mxu1 %v436_v5 }
  0x17   :  { %544 = vmatpush.bf16.msra.mxu2 %v436_v5  ;;  %545 = vmatpush.bf16.msra.mxu3 %v436_v5  ;;  %v472_v5 = vunpack.c.l.bf16 %v520_v63 }
  0x1a   :  { %184 = vmatpush.bf16.msra.mxu0 %v435_v6  ;;  %546 = vmatpush.bf16.msra.mxu1 %v435_v6 }
  0x1b   :  { %547 = vmatpush.bf16.msra.mxu2 %v435_v6  ;;  %548 = vmatpush.bf16.msra.mxu3 %v435_v6  ;;  %v465_v6 = vunpack.c.h.bf16 %v518_v62 }
  0x1e   :  { %185 = vmatpush.bf16.msra.mxu0 %v434_v7  ;;  %549 = vmatpush.bf16.msra.mxu1 %v434_v7 }
  0x1f   :  { %550 = vmatpush.bf16.msra.mxu2 %v434_v7  ;;  %551 = vmatpush.bf16.msra.mxu3 %v434_v7  ;;  %v473_v7 = vunpack.c.h.bf16 %v520_v63 }
  0x21   :  { %186 = vmatmul.bf16.vlgmr.msra.gmra.mxu0 %v426_v8  ;;  %196 = vmatmul.bf16.vlgmr.msra.gmra.mxu1 %v428_v9 }
  0x22   :  { %206 = vmatmul.bf16.vlgmr.msra.gmra.mxu2 %v430_v10  ;;  %216 = vmatmul.bf16.vlgmr.msra.gmra.mxu3 %v432_v11 }
  0x31   :  { %191 = vmatmul.bf16.gmra.mxu0 %v427_v12  ;;  %201 = vmatmul.bf16.gmra.mxu1 %v429_v13 }
  0x32   :  { %211 = vmatmul.bf16.gmra.mxu2 %v431_v14  ;;  %221 = vmatmul.bf16.gmra.mxu3 %v433_v15 }
  0x9e   :  { %v187_v16 = vpop.f32.mrf.mxu0  ;;  %v197_v17 = vpop.f32.mrf.mxu1 }
  0x9f   :  { %v310_v28 = vadd.f32 %v444_v20, %v187_v16  ;;  %v314_v29 = vadd.f32 %v452_v21, %v197_v17 }
  0xa5   :  { %v207_v24 = vpop.f32.mrf.mxu2  ;;  %v217_v25 = vpop.f32.mrf.mxu3 }
  0xa6   :  { %v189_v26 = vpop.f32.mrf.mxu0  ;;  %v199_v27 = vpop.f32.mrf.mxu1  ;;  %v318_v42 = vadd.f32 %v460_v36, %v207_v24  ;;  %v322_v43 = vadd.f32 %v468_v37, %v217_v25 }
  0xa7   :  { %v311_v32 = vadd.f32 %v445_v22, %v189_v26  ;;  %v315_v33 = vadd.f32 %v453_v23, %v199_v27 }
  0xa9   :  { %v477_v34 = vpack.c.bf16 %v311_v32, %v310_v28  ;;  %v487_v35 = vpack.c.bf16 %v315_v33, %v314_v29 }
  0xab   :  { %478 = vst [vmem:[%s671_s3] sm:$0xff] %v477_v34  }
  0xac   :  { %522 = vst [vmem:[%s671_s3 + $0x10] sm:$0xff] %v487_v35  }
  0xad   :  { %v209_v40 = vpop.f32.mrf.mxu2  ;;  %v219_v41 = vpop.f32.mrf.mxu3 }
  0xae   :  { %v319_v44 = vadd.f32 %v461_v38, %v209_v40  ;;  %v323_v45 = vadd.f32 %v469_v39, %v219_v41  ;;  %v192_v46 = vpop.f32.mrf.mxu0  ;;  %v202_v47 = vpop.f32.mrf.mxu1 }
  0xaf   :  { %v312_v60 = vadd.f32 %v448_v52, %v192_v46  ;;  %v316_v61 = vadd.f32 %v456_v53, %v202_v47 }
  0xb0   :  { %v497_v48 = vpack.c.bf16 %v319_v44, %v318_v42  ;;  %v507_v49 = vpack.c.bf16 %v323_v45, %v322_v43 }
  0xb2   :  { %524 = vst [vmem:[%s671_s3 + $0x20] sm:$0xff] %v497_v48  }
  0xb3   :  { %526 = vst [vmem:[%s671_s3 + $0x30] sm:$0xff] %v507_v49  }
  0xb5   :  { %v212_v56 = vpop.f32.mrf.mxu2  ;;  %v222_v57 = vpop.f32.mrf.mxu3 }
  0xb6   :  { %v194_v58 = vpop.f32.mrf.mxu0  ;;  %v204_v59 = vpop.f32.mrf.mxu1  ;;  %v320_v10 = vadd.f32 %v464_v4, %v212_v56  ;;  %v324_v11 = vadd.f32 %v472_v5, %v222_v57 }
  0xb7   :  { %v313_v0 = vadd.f32 %v449_v54, %v194_v58  ;;  %v317_v1 = vadd.f32 %v457_v55, %v204_v59 }
  0xb9   :  { %v482_v2 = vpack.c.bf16 %v313_v0, %v312_v60  ;;  %v492_v3 = vpack.c.bf16 %v317_v1, %v316_v61 }
  0xbb   :  { %521 = vst [vmem:[%s671_s3 + $0x8] sm:$0xff] %v482_v2  }
  0xbc   :  { %523 = vst [vmem:[%s671_s3 + $0x18] sm:$0xff] %v492_v3  }
  0xbd   :  { %v214_v8 = vpop.f32.mrf.mxu2  ;;  %v224_v9 = vpop.f32.mrf.mxu3 }
  0xbe   :  { %v321_v12 = vadd.f32 %v465_v6, %v214_v8  ;;  %v325_v13 = vadd.f32 %v473_v7, %v224_v9 }
  0xc0   :  { %v502_v14 = vpack.c.bf16 %v321_v12, %v320_v10  ;;  %v512_v15 = vpack.c.bf16 %v325_v13, %v324_v11 }
  0xc2   :  { %525 = vst [vmem:[%s671_s3 + $0x28] sm:$0xff] %v502_v14  }
  0xc3   :  { %527 = vst [vmem:[%s671_s3 + $0x38] sm:$0xff] %v512_v15  }

</bundles_post_ra>
